<compile_context>
chip_gen: v6e
topology: v6e:2x2x1
jax: 0.10.0
libtpu: 0.0.40
codegen_flags: <defaults>
</compile_context>

<pallas_src>
import jax
import jax.numpy as jnp
from jax.experimental import pallas as pl
from jax.experimental.pallas import tpu as pltpu

_EPS = 1e-5
_LANE = 128  # pad every feature dimension to a full vreg lane width

# Row layout of the packed (14, 128) bias/gamma/beta slab:
#   0:b1 1:g1 2:be1 | 3:b2 4:g2 5:be2 | 6:b3 | 7:b4 8:g3 9:be3 | 10:b5 11:g4 12:be4 | 13:b6


def ae_kernel(x_ref, w_ref, v_ref, out_ref):
    """Whole AE forward (encoder + decoder) on one VMEM-resident, 128-lane-padded tile.

    x_ref:   (B, 128)        padded input activations
    w_ref:   (6, 128, 128)   padded, pre-transposed Linear weights (y = x @ W + b)
    v_ref:   (14, 128)       padded bias / gamma / beta rows (layout above)
    out_ref: (B, 128)        padded output (real columns sliced in the wrapper)
    """
    inv_b = 1.0 / float(x_ref.shape[0])  # static batch size -> trace-time constant

    def lin(h, wi, bi):
        # MXU matmul with f32 accumulation; bias row broadcasts over the batch.
        return (jnp.dot(h, w_ref[wi], preferred_element_type=jnp.float32)
                + v_ref[bi:bi + 1, :])

    def bn(h, gi, bi):
        # BatchNorm1d, training mode: single-pass batch moments (biased variance).
        s1 = jnp.sum(h, axis=0, keepdims=True)
        s2 = jnp.sum(h * h, axis=0, keepdims=True)
        mean = s1 * inv_b
        var = s2 * inv_b - mean * mean
        inv_std = jax.lax.rsqrt(var + _EPS)
        return (h - mean) * inv_std * v_ref[gi:gi + 1, :] + v_ref[bi:bi + 1, :]

    def relu(h):
        return jnp.maximum(h, 0.0)

    x = x_ref[...]
    # --- encoder: Linear -> ReLU -> BN -> Linear -> ReLU -> BN -> Linear -> ReLU
    h = bn(relu(lin(x, 0, 0)), 1, 2)
    h = bn(relu(lin(h, 1, 3)), 4, 5)
    z = relu(lin(h, 2, 6))
    # --- decoder: Linear -> ReLU -> BN -> Linear -> ReLU -> BN -> Linear
    h = bn(relu(lin(z, 3, 7)), 8, 9)
    h = bn(relu(lin(h, 4, 10)), 11, 12)
    out_ref[...] = lin(h, 5, 13).astype(out_ref.dtype)


@jax.jit
def ae_forward(x, w_packed, v_packed):
    """x: (B, F) float32. Returns the reconstruction (B, F)."""
    B, F = x.shape
    x_padded = jnp.pad(x, ((0, 0), (0, _LANE - F)))
    out_padded = pl.pallas_call(
        ae_kernel,
        out_shape=jax.ShapeDtypeStruct((B, _LANE), x.dtype),
        in_specs=[pl.BlockSpec(memory_space=pltpu.MemorySpace.VMEM)] * 3,
        out_specs=pl.BlockSpec(memory_space=pltpu.MemorySpace.VMEM),
    )(x_padded, w_packed, v_packed)
    return out_padded[:, :F]


def init_params(key, input_shape, latent_nodes, hidden_nodes):
    """Deterministic synthetic init (PyTorch-style U(-1/sqrt(fan_in), +)); logical shapes."""
    dims = [
        (input_shape, hidden_nodes),   # enc Linear 1  (+ BN1)
        (hidden_nodes, hidden_nodes),  # enc Linear 2  (+ BN2)
        (hidden_nodes, latent_nodes),  # enc Linear 3
        (latent_nodes, hidden_nodes),  # dec Linear 1  (+ BN3)
        (hidden_nodes, hidden_nodes),  # dec Linear 2  (+ BN4)
        (hidden_nodes, input_shape),   # dec Linear 3
    ]
    has_bn = [True, True, False, True, True, False]
    params = []
    for (fan_in, fan_out), bn_flag in zip(dims, has_bn):
        key, kw, kb, kg, kbe = jax.random.split(key, 5)
        bound = 1.0 / jnp.sqrt(float(fan_in))
        w = jax.random.uniform(kw, (fan_in, fan_out), jnp.float32, -bound, bound)
        b = jax.random.uniform(kb, (1, fan_out), jnp.float32, -bound, bound)
        params += [w, b]
        if bn_flag:
            gamma = 1.0 + 0.05 * jax.random.normal(kg, (1, fan_out), jnp.float32)
            beta = 0.05 * jax.random.normal(kbe, (1, fan_out), jnp.float32)
            params += [gamma, beta]
    return tuple(params)


def pack_params(params):
    """Zero-pad every feature dim to 128 lanes and pack into two arrays for the kernel."""
    (w1, b1, g1, be1, w2, b2, g2, be2, w3, b3,
     w4, b4, g3, be3, w5, b5, g4, be4, w6, b6) = params

    def pad_w(w):
        return jnp.pad(w, ((0, _LANE - w.shape[0]), (0, _LANE - w.shape[1])))

    def pad_v(v):
        v = v.reshape(1, -1)
        return jnp.pad(v, ((0, 0), (0, _LANE - v.shape[1])))

    w_packed = jnp.stack([pad_w(w) for w in (w1, w2, w3, w4, w5, w6)])
    v_rows = (b1, g1, be1, b2, g2, be2, b3, b4, g3, be3, b5, g4, be4, b6)
    v_packed = jnp.concatenate([pad_v(v) for v in v_rows], axis=0)
    return w_packed, v_packed


def ae_forward_ref(x, params):
    """Plain-JAX reference (two-pass BN, matches PyTorch training-mode BatchNorm1d)."""
    (w1, b1, g1, be1, w2, b2, g2, be2, w3, b3,
     w4, b4, g3, be3, w5, b5, g4, be4, w6, b6) = params

    def lin(h, w, b):
        return h @ w + b

    def bn(h, g, be):
        mean = jnp.mean(h, axis=0, keepdims=True)
        var = jnp.mean((h - mean) ** 2, axis=0, keepdims=True)
        return (h - mean) / jnp.sqrt(var + _EPS) * g + be

    relu = lambda h: jnp.maximum(h, 0.0)
    h = bn(relu(lin(x, w1, b1)), g1, be1)
    h = bn(relu(lin(h, w2, b2)), g2, be2)
    z = relu(lin(h, w3, b3))
    h = bn(relu(lin(z, w4, b4)), g3, be3)
    h = bn(relu(lin(h, w5, b5)), g4, be4)
    return lin(h, w6, b6)


if __name__ == "__main__":
    B, INPUT, LATENT, HIDDEN = 8, 32, 8, 32

    key = jax.random.PRNGKey(0)
    key_x, key_p = jax.random.split(key)
    x = jax.random.normal(key_x, (B, INPUT), jnp.float32)
    params = init_params(key_p, INPUT, LATENT, HIDDEN)
    w_packed, v_packed = pack_params(params)

    out = ae_forward(x, w_packed, v_packed)
    out = jax.block_until_ready(out)

    ref = ae_forward_ref(x, params)
    assert out.shape == (B, INPUT), out.shape
    # 1e-3 tolerance: one-pass BN moments + rsqrt differ from the two-pass f32 reference
    # only at round-off level; real bugs show up as O(1) errors.
    assert jnp.allclose(out, ref, atol=1e-3, rtol=1e-3), "mismatch vs JAX reference"

    print("KERNEL_OK")
</pallas_src>

<mosaic_0001>
module attributes {stable_mosaic.version = 11 : i64} {
  func.func @ae_kernel(%arg0: memref<8x128xf32, #tpu.memory_space<vmem>>, %arg1: memref<6x128x128xf32, #tpu.memory_space<vmem>>, %arg2: memref<14x128xf32, #tpu.memory_space<vmem>>, %arg3: memref<8x128xf32, #tpu.memory_space<vmem>>) attributes {dimension_semantics = [], scalar_prefetch = 0 : i64, scratch_operands = 0 : i64, tpu.core_type = #tpu.core_type<tc>} {
    %c0 = arith.constant 0 : index
    %c0_0 = arith.constant 0 : index
    %0 = vector.load %arg0[%c0, %c0_0] : memref<8x128xf32, #tpu.memory_space<vmem>>, vector<8x128xf32>
    %c0_1 = arith.constant 0 : index
    %c0_2 = arith.constant 0 : index
    %c0_3 = arith.constant 0 : index
    %1 = vector.load %arg1[%c0_1, %c0_2, %c0_3] : memref<6x128x128xf32, #tpu.memory_space<vmem>>, vector<1x128x128xf32>
    %2 = vector.shape_cast %1 : vector<1x128x128xf32> to vector<128x128xf32>
    %cst = arith.constant dense<0.000000e+00> : vector<8x128xf32>
    %3 = tpu.matmul %0, %2, %cst {dimension_numbers = #tpu.dot_dimension_numbers<[1], [0], [0], [1], [0, 0, 1, 1], [], []>} : vector<8x128xf32>, vector<128x128xf32>, vector<8x128xf32> -> vector<8x128xf32>
    %c0_4 = arith.constant 0 : index
    %c0_5 = arith.constant 0 : index
    %4 = vector.load %arg2[%c0_4, %c0_5] : memref<14x128xf32, #tpu.memory_space<vmem>>, vector<1x128xf32>
    %5 = vector.broadcast %4 : vector<1x128xf32> to vector<8x128xf32>
    %6 = arith.addf %3, %5 : vector<8x128xf32>
    %cst_6 = arith.constant 0.000000e+00 : f32
    %7 = vector.broadcast %cst_6 : f32 to vector<8x128xf32>
    %8 = arith.maximumf %6, %7 : vector<8x128xf32>
    %cst_7 = arith.constant dense<0.000000e+00> : vector<128xf32>
    %9 = vector.multi_reduction <add>, %8, %cst_7 [0] : vector<8x128xf32> to vector<128xf32>
    %10 = vector.shape_cast %9 : vector<128xf32> to vector<1x128xf32>
    %11 = arith.mulf %8, %8 : vector<8x128xf32>
    %cst_8 = arith.constant dense<0.000000e+00> : vector<128xf32>
    %12 = vector.multi_reduction <add>, %11, %cst_8 [0] : vector<8x128xf32> to vector<128xf32>
    %13 = vector.shape_cast %12 : vector<128xf32> to vector<1x128xf32>
    %cst_9 = arith.constant 1.250000e-01 : f32
    %14 = vector.broadcast %cst_9 : f32 to vector<1x128xf32>
    %15 = arith.mulf %10, %14 : vector<1x128xf32>
    %cst_10 = arith.constant 1.250000e-01 : f32
    %16 = vector.broadcast %cst_10 : f32 to vector<1x128xf32>
    %17 = arith.mulf %13, %16 : vector<1x128xf32>
    %18 = arith.mulf %15, %15 : vector<1x128xf32>
    %19 = arith.subf %17, %18 : vector<1x128xf32>
    %cst_11 = arith.constant 9.99999974E-6 : f32
    %20 = vector.broadcast %cst_11 : f32 to vector<1x128xf32>
    %21 = arith.addf %19, %20 : vector<1x128xf32>
    %22 = math.rsqrt %21 : vector<1x128xf32>
    %23 = vector.broadcast %15 : vector<1x128xf32> to vector<8x128xf32>
    %24 = arith.subf %8, %23 : vector<8x128xf32>
    %25 = vector.broadcast %22 : vector<1x128xf32> to vector<8x128xf32>
    %26 = arith.mulf %24, %25 : vector<8x128xf32>
    %c1 = arith.constant 1 : index
    %c0_12 = arith.constant 0 : index
    %27 = vector.load %arg2[%c1, %c0_12] : memref<14x128xf32, #tpu.memory_space<vmem>>, vector<1x128xf32>
    %28 = vector.broadcast %27 : vector<1x128xf32> to vector<8x128xf32>
    %29 = arith.mulf %26, %28 : vector<8x128xf32>
    %c2 = arith.constant 2 : index
    %c0_13 = arith.constant 0 : index
    %30 = vector.load %arg2[%c2, %c0_13] : memref<14x128xf32, #tpu.memory_space<vmem>>, vector<1x128xf32>
    %31 = vector.broadcast %30 : vector<1x128xf32> to vector<8x128xf32>
    %32 = arith.addf %29, %31 : vector<8x128xf32>
    %c1_14 = arith.constant 1 : index
    %c0_15 = arith.constant 0 : index
    %c0_16 = arith.constant 0 : index
    %33 = vector.load %arg1[%c1_14, %c0_15, %c0_16] : memref<6x128x128xf32, #tpu.memory_space<vmem>>, vector<1x128x128xf32>
    %34 = vector.shape_cast %33 : vector<1x128x128xf32> to vector<128x128xf32>
    %cst_17 = arith.constant dense<0.000000e+00> : vector<8x128xf32>
    %35 = tpu.matmul %32, %34, %cst_17 {dimension_numbers = #tpu.dot_dimension_numbers<[1], [0], [0], [1], [0, 0, 1, 1], [], []>} : vector<8x128xf32>, vector<128x128xf32>, vector<8x128xf32> -> vector<8x128xf32>
    %c3 = arith.constant 3 : index
    %c0_18 = arith.constant 0 : index
    %36 = vector.load %arg2[%c3, %c0_18] : memref<14x128xf32, #tpu.memory_space<vmem>>, vector<1x128xf32>
    %37 = vector.broadcast %36 : vector<1x128xf32> to vector<8x128xf32>
    %38 = arith.addf %35, %37 : vector<8x128xf32>
    %cst_19 = arith.constant 0.000000e+00 : f32
    %39 = vector.broadcast %cst_19 : f32 to vector<8x128xf32>
    %40 = arith.maximumf %38, %39 : vector<8x128xf32>
    %cst_20 = arith.constant dense<0.000000e+00> : vector<128xf32>
    %41 = vector.multi_reduction <add>, %40, %cst_20 [0] : vector<8x128xf32> to vector<128xf32>
    %42 = vector.shape_cast %41 : vector<128xf32> to vector<1x128xf32>
    %43 = arith.mulf %40, %40 : vector<8x128xf32>
    %cst_21 = arith.constant dense<0.000000e+00> : vector<128xf32>
    %44 = vector.multi_reduction <add>, %43, %cst_21 [0] : vector<8x128xf32> to vector<128xf32>
    %45 = vector.shape_cast %44 : vector<128xf32> to vector<1x128xf32>
    %cst_22 = arith.constant 1.250000e-01 : f32
    %46 = vector.broadcast %cst_22 : f32 to vector<1x128xf32>
    %47 = arith.mulf %42, %46 : vector<1x128xf32>
    %cst_23 = arith.constant 1.250000e-01 : f32
    %48 = vector.broadcast %cst_23 : f32 to vector<1x128xf32>
    %49 = arith.mulf %45, %48 : vector<1x128xf32>
    %50 = arith.mulf %47, %47 : vector<1x128xf32>
    %51 = arith.subf %49, %50 : vector<1x128xf32>
    %cst_24 = arith.constant 9.99999974E-6 : f32
    %52 = vector.broadcast %cst_24 : f32 to vector<1x128xf32>
    %53 = arith.addf %51, %52 : vector<1x128xf32>
    %54 = math.rsqrt %53 : vector<1x128xf32>
    %55 = vector.broadcast %47 : vector<1x128xf32> to vector<8x128xf32>
    %56 = arith.subf %40, %55 : vector<8x128xf32>
    %57 = vector.broadcast %54 : vector<1x128xf32> to vector<8x128xf32>
    %58 = arith.mulf %56, %57 : vector<8x128xf32>
    %c4 = arith.constant 4 : index
    %c0_25 = arith.constant 0 : index
    %59 = vector.load %arg2[%c4, %c0_25] : memref<14x128xf32, #tpu.memory_space<vmem>>, vector<1x128xf32>
    %60 = vector.broadcast %59 : vector<1x128xf32> to vector<8x128xf32>
    %61 = arith.mulf %58, %60 : vector<8x128xf32>
    %c5 = arith.constant 5 : index
    %c0_26 = arith.constant 0 : index
    %62 = vector.load %arg2[%c5, %c0_26] : memref<14x128xf32, #tpu.memory_space<vmem>>, vector<1x128xf32>
    %63 = vector.broadcast %62 : vector<1x128xf32> to vector<8x128xf32>
    %64 = arith.addf %61, %63 : vector<8x128xf32>
    %c2_27 = arith.constant 2 : index
    %c0_28 = arith.constant 0 : index
    %c0_29 = arith.constant 0 : index
    %65 = vector.load %arg1[%c2_27, %c0_28, %c0_29] : memref<6x128x128xf32, #tpu.memory_space<vmem>>, vector<1x128x128xf32>
    %66 = vector.shape_cast %65 : vector<1x128x128xf32> to vector<128x128xf32>
    %cst_30 = arith.constant dense<0.000000e+00> : vector<8x128xf32>
    %67 = tpu.matmul %64, %66, %cst_30 {dimension_numbers = #tpu.dot_dimension_numbers<[1], [0], [0], [1], [0, 0, 1, 1], [], []>} : vector<8x128xf32>, vector<128x128xf32>, vector<8x128xf32> -> vector<8x128xf32>
    %c6 = arith.constant 6 : index
    %c0_31 = arith.constant 0 : index
    %68 = vector.load %arg2[%c6, %c0_31] : memref<14x128xf32, #tpu.memory_space<vmem>>, vector<1x128xf32>
    %69 = vector.broadcast %68 : vector<1x128xf32> to vector<8x128xf32>
    %70 = arith.addf %67, %69 : vector<8x128xf32>
    %cst_32 = arith.constant 0.000000e+00 : f32
    %71 = vector.broadcast %cst_32 : f32 to vector<8x128xf32>
    %72 = arith.maximumf %70, %71 : vector<8x128xf32>
    %c3_33 = arith.constant 3 : index
    %c0_34 = arith.constant 0 : index
    %c0_35 = arith.constant 0 : index
    %73 = vector.load %arg1[%c3_33, %c0_34, %c0_35] : memref<6x128x128xf32, #tpu.memory_space<vmem>>, vector<1x128x128xf32>
    %74 = vector.shape_cast %73 : vector<1x128x128xf32> to vector<128x128xf32>
    %cst_36 = arith.constant dense<0.000000e+00> : vector<8x128xf32>
    %75 = tpu.matmul %72, %74, %cst_36 {dimension_numbers = #tpu.dot_dimension_numbers<[1], [0], [0], [1], [0, 0, 1, 1], [], []>} : vector<8x128xf32>, vector<128x128xf32>, vector<8x128xf32> -> vector<8x128xf32>
    %c7 = arith.constant 7 : index
    %c0_37 = arith.constant 0 : index
    %76 = vector.load %arg2[%c7, %c0_37] : memref<14x128xf32, #tpu.memory_space<vmem>>, vector<1x128xf32>
    %77 = vector.broadcast %76 : vector<1x128xf32> to vector<8x128xf32>
    %78 = arith.addf %75, %77 : vector<8x128xf32>
    %cst_38 = arith.constant 0.000000e+00 : f32
    %79 = vector.broadcast %cst_38 : f32 to vector<8x128xf32>
    %80 = arith.maximumf %78, %79 : vector<8x128xf32>
    %cst_39 = arith.constant dense<0.000000e+00> : vector<128xf32>
    %81 = vector.multi_reduction <add>, %80, %cst_39 [0] : vector<8x128xf32> to vector<128xf32>
    %82 = vector.shape_cast %81 : vector<128xf32> to vector<1x128xf32>
    %83 = arith.mulf %80, %80 : vector<8x128xf32>
    %cst_40 = arith.constant dense<0.000000e+00> : vector<128xf32>
    %84 = vector.multi_reduction <add>, %83, %cst_40 [0] : vector<8x128xf32> to vector<128xf32>
    %85 = vector.shape_cast %84 : vector<128xf32> to vector<1x128xf32>
    %cst_41 = arith.constant 1.250000e-01 : f32
    %86 = vector.broadcast %cst_41 : f32 to vector<1x128xf32>
    %87 = arith.mulf %82, %86 : vector<1x128xf32>
    %cst_42 = arith.constant 1.250000e-01 : f32
    %88 = vector.broadcast %cst_42 : f32 to vector<1x128xf32>
    %89 = arith.mulf %85, %88 : vector<1x128xf32>
    %90 = arith.mulf %87, %87 : vector<1x128xf32>
    %91 = arith.subf %89, %90 : vector<1x128xf32>
    %cst_43 = arith.constant 9.99999974E-6 : f32
    %92 = vector.broadcast %cst_43 : f32 to vector<1x128xf32>
    %93 = arith.addf %91, %92 : vector<1x128xf32>
    %94 = math.rsqrt %93 : vector<1x128xf32>
    %95 = vector.broadcast %87 : vector<1x128xf32> to vector<8x128xf32>
    %96 = arith.subf %80, %95 : vector<8x128xf32>
    %97 = vector.broadcast %94 : vector<1x128xf32> to vector<8x128xf32>
    %98 = arith.mulf %96, %97 : vector<8x128xf32>
    %c8 = arith.constant 8 : index
    %c0_44 = arith.constant 0 : index
    %99 = vector.load %arg2[%c8, %c0_44] : memref<14x128xf32, #tpu.memory_space<vmem>>, vector<1x128xf32>
    %100 = vector.broadcast %99 : vector<1x128xf32> to vector<8x128xf32>
    %101 = arith.mulf %98, %100 : vector<8x128xf32>
    %c9 = arith.constant 9 : index
    %c0_45 = arith.constant 0 : index
    %102 = vector.load %arg2[%c9, %c0_45] : memref<14x128xf32, #tpu.memory_space<vmem>>, vector<1x128xf32>
    %103 = vector.broadcast %102 : vector<1x128xf32> to vector<8x128xf32>
    %104 = arith.addf %101, %103 : vector<8x128xf32>
    %c4_46 = arith.constant 4 : index
    %c0_47 = arith.constant 0 : index
    %c0_48 = arith.constant 0 : index
    %105 = vector.load %arg1[%c4_46, %c0_47, %c0_48] : memref<6x128x128xf32, #tpu.memory_space<vmem>>, vector<1x128x128xf32>
    %106 = vector.shape_cast %105 : vector<1x128x128xf32> to vector<128x128xf32>
    %cst_49 = arith.constant dense<0.000000e+00> : vector<8x128xf32>
    %107 = tpu.matmul %104, %106, %cst_49 {dimension_numbers = #tpu.dot_dimension_numbers<[1], [0], [0], [1], [0, 0, 1, 1], [], []>} : vector<8x128xf32>, vector<128x128xf32>, vector<8x128xf32> -> vector<8x128xf32>
    %c10 = arith.constant 10 : index
    %c0_50 = arith.constant 0 : index
    %108 = vector.load %arg2[%c10, %c0_50] : memref<14x128xf32, #tpu.memory_space<vmem>>, vector<1x128xf32>
    %109 = vector.broadcast %108 : vector<1x128xf32> to vector<8x128xf32>
    %110 = arith.addf %107, %109 : vector<8x128xf32>
    %cst_51 = arith.constant 0.000000e+00 : f32
    %111 = vector.broadcast %cst_51 : f32 to vector<8x128xf32>
    %112 = arith.maximumf %110, %111 : vector<8x128xf32>
    %cst_52 = arith.constant dense<0.000000e+00> : vector<128xf32>
    %113 = vector.multi_reduction <add>, %112, %cst_52 [0] : vector<8x128xf32> to vector<128xf32>
    %114 = vector.shape_cast %113 : vector<128xf32> to vector<1x128xf32>
    %115 = arith.mulf %112, %112 : vector<8x128xf32>
    %cst_53 = arith.constant dense<0.000000e+00> : vector<128xf32>
    %116 = vector.multi_reduction <add>, %115, %cst_53 [0] : vector<8x128xf32> to vector<128xf32>
    %117 = vector.shape_cast %116 : vector<128xf32> to vector<1x128xf32>
    %cst_54 = arith.constant 1.250000e-01 : f32
    %118 = vector.broadcast %cst_54 : f32 to vector<1x128xf32>
    %119 = arith.mulf %114, %118 : vector<1x128xf32>
    %cst_55 = arith.constant 1.250000e-01 : f32
    %120 = vector.broadcast %cst_55 : f32 to vector<1x128xf32>
    %121 = arith.mulf %117, %120 : vector<1x128xf32>
    %122 = arith.mulf %119, %119 : vector<1x128xf32>
    %123 = arith.subf %121, %122 : vector<1x128xf32>
    %cst_56 = arith.constant 9.99999974E-6 : f32
    %124 = vector.broadcast %cst_56 : f32 to vector<1x128xf32>
    %125 = arith.addf %123, %124 : vector<1x128xf32>
    %126 = math.rsqrt %125 : vector<1x128xf32>
    %127 = vector.broadcast %119 : vector<1x128xf32> to vector<8x128xf32>
    %128 = arith.subf %112, %127 : vector<8x128xf32>
    %129 = vector.broadcast %126 : vector<1x128xf32> to vector<8x128xf32>
    %130 = arith.mulf %128, %129 : vector<8x128xf32>
    %c11 = arith.constant 11 : index
    %c0_57 = arith.constant 0 : index
    %131 = vector.load %arg2[%c11, %c0_57] : memref<14x128xf32, #tpu.memory_space<vmem>>, vector<1x128xf32>
    %132 = vector.broadcast %131 : vector<1x128xf32> to vector<8x128xf32>
    %133 = arith.mulf %130, %132 : vector<8x128xf32>
    %c12 = arith.constant 12 : index
    %c0_58 = arith.constant 0 : index
    %134 = vector.load %arg2[%c12, %c0_58] : memref<14x128xf32, #tpu.memory_space<vmem>>, vector<1x128xf32>
    %135 = vector.broadcast %134 : vector<1x128xf32> to vector<8x128xf32>
    %136 = arith.addf %133, %135 : vector<8x128xf32>
    %c5_59 = arith.constant 5 : index
    %c0_60 = arith.constant 0 : index
    %c0_61 = arith.constant 0 : index
    %137 = vector.load %arg1[%c5_59, %c0_60, %c0_61] : memref<6x128x128xf32, #tpu.memory_space<vmem>>, vector<1x128x128xf32>
    %138 = vector.shape_cast %137 : vector<1x128x128xf32> to vector<128x128xf32>
    %cst_62 = arith.constant dense<0.000000e+00> : vector<8x128xf32>
    %139 = tpu.matmul %136, %138, %cst_62 {dimension_numbers = #tpu.dot_dimension_numbers<[1], [0], [0], [1], [0, 0, 1, 1], [], []>} : vector<8x128xf32>, vector<128x128xf32>, vector<8x128xf32> -> vector<8x128xf32>
    %c13 = arith.constant 13 : index
    %c0_63 = arith.constant 0 : index
    %140 = vector.load %arg2[%c13, %c0_63] : memref<14x128xf32, #tpu.memory_space<vmem>>, vector<1x128xf32>
    %141 = vector.broadcast %140 : vector<1x128xf32> to vector<8x128xf32>
    %142 = arith.addf %139, %141 : vector<8x128xf32>
    %c0_64 = arith.constant 0 : index
    %c0_65 = arith.constant 0 : index
    %143 = vector.load %arg3[%c0_64, %c0_65] : memref<8x128xf32, #tpu.memory_space<vmem>>, vector<8x128xf32>
    tpu.vector_store %arg3[%c0_64, %c0_65], %142 {strides = array<i32>} : memref<8x128xf32, #tpu.memory_space<vmem>>, vector<8x128xf32>,
    return
  }
}

</mosaic_0001>

<bundles_post_ra>
// kernel: ae_forward.1
= control target key start
LH: loop header
LB: loop body
LE: loop exit
PB: predicated region body
PF: predicated region fallthrough
CT: control target
= control target key end

     0   :  { %8 = vsyncpa [#allocation3], 0  ;;  %s1303_s0 = inlined_call_operand.vmem [shape: f32[8,128], index: 0, kind: input, shape index: {}]   ;;  %s1304_s1 = inlined_call_operand.hbm [shape: f32[6,128,128], index: 1, kind: input, shape index: {}]   ;;  %s1305_s2 = inlined_call_operand.vmem [shape: f32[14,128], index: 2, kind: input, shape index: {}]   ;;  %s1306_s3 = inlined_call_operand.hbm [shape: f32[8,128], index: 3, kind: output, shape index: {}]  }
   0x1   :  { %9 = vsyncpa [#allocation4], 0  ;;  %s1118_s12 = smov [#allocation2]  }
   0x2   :  { %s17_s13 = sshll.u32 %s1118_s12, 4  ;;  %s18_s13 = int_to_ptr.vmem [resolvable:$true] %s17_s13 }
   0x3   :  { %s1082_s14 = scalar_lea.vmem %s18_s13, 12288  ;;  %p1087_p1 = scmp.lt.s32.totalorder %s18_s13, %s18_s13 }
   0x4   :  { %p1083_p0 = scmp.ne.s32.totalorder %s18_s13, %s1082_s14  ;;  %p1088_p2 = scmp.lt.s32.totalorder %s1082_s14, %s1082_s14 }
   0x6   :  { %p1089_p3 = por %p1088_p2, %p1087_p1 }
   0x8   :  { %p1090_p4 = pnand %p1089_p3, %p1083_p0 }
   0xa   :  { %1093 = shalt.err (!%p1090_p4)
}
   0xb   :  { %s1119_s15 = smov 128   ;;  %s1120_s16 = smov 8  }
   0xc   :  { %23 = dma.hbm_to_vmem [thread:$0]  %s1304_s1, 12288, %s18_s13, [#allocation3], %s1119_s15, %s1119_s15, %s1120_s16  }
   0xd   :  { %1114 = dma.done.wait [#allocation3], 12288  }
   0xe   :  { %1115 = vsyncadd [#allocation3], 4294955008  ;;  %v1121_v0 = vmov 0.0   ;;  %vm1122_vm0 = vmmov 0   ;;  %v45_v1 = vld [vmem:[#allocation2 + $0x78] sm:$0xff]  ;;  %v44_v2 = vld [vmem:[#allocation2 + $0x70] sm:$0xff] }
   0xf   :  { %850 = vmatprep.subr.mxu0 %v1121_v0  ;;  %882 = vmatprep.mubr.msk.f32.mxu0 %vm1122_vm0, %v1121_v0  ;;  %v43_v3 = vld [vmem:[#allocation2 + $0x68] sm:$0xff]  ;;  %v42_v4 = vld [vmem:[#allocation2 + $0x60] sm:$0xff]  ;;  %v41_v5 = vld [vmem:[#allocation2 + $0x58] sm:$0xff]  ;;  %s1123_s19 = smov [#allocation5]  }
  0x10   :  { %885 = vmatprep.subr.mxu1 %v1121_v0  ;;  %917 = vmatprep.mubr.msk.f32.mxu1 %vm1122_vm0, %v1121_v0  ;;  %v40_v6 = vld [vmem:[#allocation2 + $0x50] sm:$0xff]  ;;  %v39_v7 = vld [vmem:[#allocation2 + $0x48] sm:$0xff]  ;;  %v38_v8 = vld [vmem:[#allocation2 + $0x40] sm:$0xff] }
  0x11   :  { %851 = vmatpush3.msra.mxu0 %v45_v1  ;;  %v37_v9 = vld [vmem:[#allocation2 + $0x38] sm:$0xff]  ;;  %v36_v10 = vld [vmem:[#allocation2 + $0x30] sm:$0xff]  ;;  %v35_v11 = vld [vmem:[#allocation2 + $0x28] sm:$0xff] }
  0x12   :  { %852 = vmatprep.subr.mxu0 %v1121_v0  ;;  %v34_v12 = vld [vmem:[#allocation2 + $0x20] sm:$0xff]  ;;  %v33_v13 = vld [vmem:[#allocation2 + $0x18] sm:$0xff]  ;;  %v32_v14 = vld [vmem:[#allocation2 + $0x10] sm:$0xff] }
  0x13   :  { %853 = vmatpush3.msra.mxu0 %v44_v2  ;;  %v31_v15 = vld [vmem:[#allocation2 + $0x8] sm:$0xff]  ;;  %v30_v16 = vld [vmem:[#allocation2] sm:$0xff]  ;;  %v171_v18 = vld [vmem:[#allocation2 + $0xf8] sm:$0xff] }
  0x14   :  { %854 = vmatprep.subr.mxu0 %v1121_v0  ;;  %v29_v17 = vld [vmem:[%s1303_s0] sm:$0xff]  ;;  %886 = vmatpush3.msra.mxu1 %v171_v18  ;;  %v170_v19 = vld [vmem:[#allocation2 + $0xf0] sm:$0xff]  ;;  %v169_v20 = vld [vmem:[#allocation2 + $0xe8] sm:$0xff]  ;;  %s725_s0 = sshll.u32 %s1123_s19, 4  ;;  %s726_s0 = int_to_ptr.vmem [resolvable:$true] %s725_s0 }
  0x15   :  { %855 = vmatpush3.msra.mxu0 %v43_v3  ;;  %887 = vmatprep.subr.mxu1 %v1121_v0  ;;  %v168_v21 = vld [vmem:[#allocation2 + $0xe0] sm:$0xff]  ;;  %v167_v22 = vld [vmem:[#allocation2 + $0xd8] sm:$0xff]  ;;  %v166_v23 = vld [vmem:[#allocation2 + $0xd0] sm:$0xff]  ;;  %s1094_s20 = scalar_lea.vmem %s726_s0, 128  ;;  %p1099_p6 = scmp.lt.s32.totalorder %s726_s0, %s726_s0 }
  0x16   :  { %856 = vmatprep.subr.mxu0 %v1121_v0  ;;  %888 = vmatpush3.msra.mxu1 %v170_v19  ;;  %v165_v24 = vld [vmem:[#allocation2 + $0xc8] sm:$0xff]  ;;  %v164_v25 = vld [vmem:[#allocation2 + $0xc0] sm:$0xff]  ;;  %v163_v26 = vld [vmem:[#allocation2 + $0xb8] sm:$0xff]  ;;  %p1095_p5 = scmp.ne.s32.totalorder %s726_s0, %s1094_s20  ;;  %p1100_p7 = scmp.lt.s32.totalorder %s1094_s20, %s1094_s20 }
  0x17   :  { %857 = vmatpush3.msra.mxu0 %v42_v4  ;;  %889 = vmatprep.subr.mxu1 %v1121_v0  ;;  %v162_v27 = vld [vmem:[#allocation2 + $0xb0] sm:$0xff]  ;;  %v161_v28 = vld [vmem:[#allocation2 + $0xa8] sm:$0xff]  ;;  %v160_v29 = vld [vmem:[#allocation2 + $0xa0] sm:$0xff] }
  0x18   :  { %858 = vmatprep.subr.mxu0 %v1121_v0  ;;  %890 = vmatpush3.msra.mxu1 %v169_v20  ;;  %v159_v30 = vld [vmem:[#allocation2 + $0x98] sm:$0xff]  ;;  %v158_v31 = vld [vmem:[#allocation2 + $0x90] sm:$0xff]  ;;  %v157_v32 = vld [vmem:[#allocation2 + $0x88] sm:$0xff]  ;;  %p1101_p8 = por %p1100_p7, %p1099_p6 }
  0x19   :  { %859 = vmatpush3.msra.mxu0 %v41_v5  ;;  %891 = vmatprep.subr.mxu1 %v1121_v0  ;;  %v156_v33 = vld [vmem:[#allocation2 + $0x80] sm:$0xff]  ;;  %v297_v1 = vld [vmem:[#allocation2 + $0x178] sm:$0xff]  ;;  %v296_v2 = vld [vmem:[#allocation2 + $0x170] sm:$0xff] }
  0x1a   :  { %860 = vmatprep.subr.mxu0 %v1121_v0  ;;  %892 = vmatpush3.msra.mxu1 %v168_v21  ;;  %v734_v34 = vld [vmem:[%s1305_s2] ss:$0 sm:$0xff]  ;;  %v735_v59 = vld [vmem:[%s1305_s2 + $0x1] ss:$0 sm:$0xff]  ;;  %v736_v61 = vld [vmem:[%s1305_s2 + $0x2] ss:$0 sm:$0xff]  ;;  %p1102_p9 = pnand %p1101_p8, %p1095_p5 }
  0x1b   :  { %861 = vmatpush3.msra.mxu0 %v40_v6  ;;  %893 = vmatprep.subr.mxu1 %v1121_v0  ;;  %v295_v3 = vld [vmem:[#allocation2 + $0x168] sm:$0xff]  ;;  %v294_v4 = vld [vmem:[#allocation2 + $0x160] sm:$0xff]  ;;  %v293_v5 = vld [vmem:[#allocation2 + $0x158] sm:$0xff] }
  0x1c   :  { %862 = vmatprep.subr.mxu0 %v1121_v0  ;;  %894 = vmatpush3.msra.mxu1 %v167_v22  ;;  %v292_v6 = vld [vmem:[#allocation2 + $0x150] sm:$0xff]  ;;  %v388_v19 = vld [vmem:[#allocation2 + $0x1e8] sm:$0xff]  ;;  %v387_v20 = vld [vmem:[#allocation2 + $0x1e0] sm:$0xff] }
  0x1d   :  { %863 = vmatpush3.msra.mxu0 %v39_v7  ;;  %895 = vmatprep.subr.mxu1 %v1121_v0  ;;  %v291_v7 = vld [vmem:[#allocation2 + $0x148] sm:$0xff]  ;;  %v389_v18 = vld [vmem:[#allocation2 + $0x1f0] sm:$0xff]  ;;  %v386_v21 = vld [vmem:[#allocation2 + $0x1d8] sm:$0xff] }
  0x1e   :  { %864 = vmatprep.subr.mxu0 %v1121_v0  ;;  %896 = vmatpush3.msra.mxu1 %v166_v23  ;;  %v385_v22 = vld [vmem:[#allocation2 + $0x1d0] sm:$0xff]  ;;  %v384_v23 = vld [vmem:[#allocation2 + $0x1c8] sm:$0xff] }
  0x1f   :  { %865 = vmatpush3.msra.mxu0 %v38_v8  ;;  %897 = vmatprep.subr.mxu1 %v1121_v0  ;;  %v290_v8 = vld [vmem:[#allocation2 + $0x140] sm:$0xff] }
  0x20   :  { %866 = vmatprep.subr.mxu0 %v1121_v0  ;;  %898 = vmatpush3.msra.mxu1 %v165_v24  ;;  %v383_v24 = vld [vmem:[#allocation2 + $0x1c0] sm:$0xff] }
  0x21   :  { %867 = vmatpush3.msra.mxu0 %v37_v9  ;;  %899 = vmatprep.subr.mxu1 %v1121_v0  ;;  %v289_v9 = vld [vmem:[#allocation2 + $0x138] sm:$0xff] }
  0x22   :  { %868 = vmatprep.subr.mxu0 %v1121_v0  ;;  %900 = vmatpush3.msra.mxu1 %v164_v25  ;;  %v382_v25 = vld [vmem:[#allocation2 + $0x1b8] sm:$0xff] }
  0x23   :  { %869 = vmatpush3.msra.mxu0 %v36_v10  ;;  %901 = vmatprep.subr.mxu1 %v1121_v0  ;;  %v288_v10 = vld [vmem:[#allocation2 + $0x130] sm:$0xff] }
  0x24   :  { %870 = vmatprep.subr.mxu0 %v1121_v0  ;;  %902 = vmatpush3.msra.mxu1 %v163_v26  ;;  %v381_v26 = vld [vmem:[#allocation2 + $0x1b0] sm:$0xff] }
  0x25   :  { %871 = vmatpush3.msra.mxu0 %v35_v11  ;;  %903 = vmatprep.subr.mxu1 %v1121_v0  ;;  %v287_v11 = vld [vmem:[#allocation2 + $0x128] sm:$0xff] }
  0x26   :  { %872 = vmatprep.subr.mxu0 %v1121_v0  ;;  %904 = vmatpush3.msra.mxu1 %v162_v27  ;;  %v380_v27 = vld [vmem:[#allocation2 + $0x1a8] sm:$0xff] }
  0x27   :  { %873 = vmatpush3.msra.mxu0 %v34_v12  ;;  %905 = vmatprep.subr.mxu1 %v1121_v0  ;;  %v286_v12 = vld [vmem:[#allocation2 + $0x120] sm:$0xff] }
  0x28   :  { %874 = vmatprep.subr.mxu0 %v1121_v0  ;;  %906 = vmatpush3.msra.mxu1 %v161_v28  ;;  %v379_v28 = vld [vmem:[#allocation2 + $0x1a0] sm:$0xff] }
  0x29   :  { %875 = vmatpush3.msra.mxu0 %v33_v13  ;;  %907 = vmatprep.subr.mxu1 %v1121_v0  ;;  %v285_v13 = vld [vmem:[#allocation2 + $0x118] sm:$0xff] }
  0x2a   :  { %876 = vmatprep.subr.mxu0 %v1121_v0  ;;  %908 = vmatpush3.msra.mxu1 %v160_v29  ;;  %v378_v29 = vld [vmem:[#allocation2 + $0x198] sm:$0xff] }
  0x2b   :  { %877 = vmatpush3.msra.mxu0 %v32_v14  ;;  %909 = vmatprep.subr.mxu1 %v1121_v0  ;;  %v284_v14 = vld [vmem:[#allocation2 + $0x110] sm:$0xff] }
  0x2c   :  { %878 = vmatprep.subr.mxu0 %v1121_v0  ;;  %910 = vmatpush3.msra.mxu1 %v159_v30  ;;  %v737_v30 = vld [vmem:[%s1305_s2 + $0x3] ss:$0 sm:$0xff] }
  0x2d   :  { %879 = vmatpush3.msra.mxu0 %v31_v15  ;;  %911 = vmatprep.subr.mxu1 %v1121_v0  ;;  %v283_v15 = vld [vmem:[#allocation2 + $0x108] sm:$0xff] }
  0x2e   :  { %880 = vmatprep.subr.mxu0 %v1121_v0  ;;  %912 = vmatpush3.msra.mxu1 %v158_v31 }
  0x2f   :  { %881 = vmatpush3.msra.mxu0 %v30_v16  ;;  %913 = vmatprep.subr.mxu1 %v1121_v0  ;;  %v282_v16 = vld [vmem:[#allocation2 + $0x100] sm:$0xff] }
  0x30   :  { %883 = vmatmul.mubr.f32.vlgmr.msra.gmra.mxu0 %v29_v17  ;;  %920 = vmatprep.subr.mxu0 %v1121_v0  ;;  %v390_v17 = vld [vmem:[#allocation2 + $0x1f8] sm:$0xff] }
  0x31   :  { %952 = vmatprep.mubr.msk.f32.mxu0 %vm1122_vm0, %v1121_v0  ;;  %914 = vmatpush3.msra.mxu1 %v157_v32 }
  0x32   :  { %915 = vmatprep.subr.mxu1 %v1121_v0  ;;  %921 = vmatpush3.msra.mxu0 %v297_v1 }
  0x33   :  { %916 = vmatpush3.msra.mxu1 %v156_v33  ;;  %922 = vmatprep.subr.mxu0 %v1121_v0 }
  0x34   :  { %955 = vmatprep.subr.mxu1 %v1121_v0  ;;  %923 = vmatpush3.msra.mxu0 %v296_v2 }
  0x35   :  { %924 = vmatprep.subr.mxu0 %v1121_v0 }
  0x36   :  { %925 = vmatpush3.msra.mxu0 %v295_v3 }
  0x37   :  { %926 = vmatprep.subr.mxu0 %v1121_v0 }
  0x38   :  { %927 = vmatpush3.msra.mxu0 %v294_v4 }
  0x39   :  { %928 = vmatprep.subr.mxu0 %v1121_v0 }
  0x3a   :  { %929 = vmatpush3.msra.mxu0 %v293_v5  ;;  %v516_v5 = vld [vmem:[#allocation2 + $0x278] sm:$0xff] }
  0x3b   :  { %930 = vmatprep.subr.mxu0 %v1121_v0 }
  0x3c   :  { %931 = vmatpush3.msra.mxu0 %v292_v6  ;;  %v515_v6 = vld [vmem:[#allocation2 + $0x270] sm:$0xff] }
  0x3d   :  { %932 = vmatprep.subr.mxu0 %v1121_v0 }
  0x3e   :  { %933 = vmatpush3.msra.mxu0 %v291_v7  ;;  %v514_v7 = vld [vmem:[#allocation2 + $0x268] sm:$0xff] }
  0x3f   :  { %934 = vmatprep.subr.mxu0 %v1121_v0 }
  0x40   :  { %935 = vmatpush3.msra.mxu0 %v290_v8  ;;  %v513_v8 = vld [vmem:[#allocation2 + $0x260] sm:$0xff] }
  0x41   :  { %936 = vmatprep.subr.mxu0 %v1121_v0 }
  0x42   :  { %937 = vmatpush3.msra.mxu0 %v289_v9  ;;  %v512_v9 = vld [vmem:[#allocation2 + $0x258] sm:$0xff] }
  0x43   :  { %938 = vmatprep.subr.mxu0 %v1121_v0 }
  0x44   :  { %939 = vmatpush3.msra.mxu0 %v288_v10  ;;  %v511_v10 = vld [vmem:[#allocation2 + $0x250] sm:$0xff] }
  0x45   :  { %940 = vmatprep.subr.mxu0 %v1121_v0 }
  0x46   :  { %941 = vmatpush3.msra.mxu0 %v287_v11  ;;  %v510_v11 = vld [vmem:[#allocation2 + $0x248] sm:$0xff] }
  0x47   :  { %942 = vmatprep.subr.mxu0 %v1121_v0 }
  0x48   :  { %943 = vmatpush3.msra.mxu0 %v286_v12  ;;  %v509_v12 = vld [vmem:[#allocation2 + $0x240] sm:$0xff] }
  0x49   :  { %944 = vmatprep.subr.mxu0 %v1121_v0 }
  0x4a   :  { %945 = vmatpush3.msra.mxu0 %v285_v13  ;;  %v508_v13 = vld [vmem:[#allocation2 + $0x238] sm:$0xff] }
  0x4b   :  { %946 = vmatprep.subr.mxu0 %v1121_v0 }
  0x4c   :  { %947 = vmatpush3.msra.mxu0 %v284_v14  ;;  %v507_v14 = vld [vmem:[#allocation2 + $0x230] sm:$0xff] }
  0x4d   :  { %948 = vmatprep.subr.mxu0 %v1121_v0 }
  0x4e   :  { %949 = vmatpush3.msra.mxu0 %v283_v15  ;;  %v506_v15 = vld [vmem:[#allocation2 + $0x228] sm:$0xff] }
  0x4f   :  { %950 = vmatprep.subr.mxu0 %v1121_v0 }
  0x50   :  { %951 = vmatpush3.msra.mxu0 %v282_v16  ;;  %v505_v16 = vld [vmem:[#allocation2 + $0x220] sm:$0xff] }
  0x51   :  { %990 = vmatprep.subr.mxu0 %v1121_v0 }
  0xf0   :  { %v117_v35 = vpop.f32.mrf.mxu0 }
  0xf1   :  { %v118_v36 = vadd.f32 %v734_v34, %v117_v35 }
  0xf2   :  { %v884_v37 = vpop.f32.mrf.mxu0 }
  0xf3   :  { %v121_v38 = vmax.f32 %v118_v36, 0.0 }
  0xf5   :  { %v122_v39 = vrot.slane %v121_v38, 4  ;;  %v128_v40 = vmul.f32 %v121_v38, %v121_v38 }
  0xf7   :  { %v123_v41 = vadd.f32 %v122_v39, %v121_v38  ;;  %v129_v42 = vrot.slane %v128_v40, 4 }
  0xf9   :  { %v124_v43 = vrot.slane %v123_v41, 2  ;;  %v130_v44 = vadd.f32 %v129_v42, %v128_v40 }
  0xfb   :  { %v125_v45 = vadd.f32 %v124_v43, %v123_v41  ;;  %v131_v46 = vrot.slane %v130_v44, 2 }
  0xfd   :  { %v126_v47 = vrot.slane %v125_v45, 1  ;;  %v132_v48 = vadd.f32 %v131_v46, %v130_v44 }
  0xff   :  { %v127_v49 = vadd.f32 %v126_v47, %v125_v45  ;;  %v133_v50 = vrot.slane %v132_v48, 1 }
 0x101   :  { %v134_v51 = vadd.f32 %v133_v50, %v132_v48  ;;  %v135_v52 = vmul.f32 0.125, %v127_v49 }
 0x103   :  { %v136_v53 = vmul.f32 0.125, %v134_v51  ;;  %v137_v54 = vmul.f32 %v135_v52, %v135_v52  ;;  %v141_v57 = vsub.f32 %v121_v38, %v135_v52 }
 0x105   :  { %v138_v55 = vsub.f32 %v136_v53, %v137_v54 }
 0x107   :  { %v139_v56 = vadd.f32 1e-05, %v138_v55  ;;  %v738_v55 = vld [vmem:[%s1305_s2 + $0x4] ss:$0 sm:$0xff] }
 0x109   :  { %1066 = vrsqrt.f32 %v139_v56 }
 0x116   :  { %v1067_v58 = vpop.eup %1066 }
 0x117   :  { %v142_v60 = vmul.f32 %v1067_v58, %v141_v57  ;;  %v739_v57 = vld [vmem:[%s1305_s2 + $0x5] ss:$0 sm:$0xff] }
 0x119   :  { %v148_v62 = vmul.f32 %v735_v59, %v142_v60  ;;  %v377_v60 = vld [vmem:[#allocation2 + $0x190] sm:$0xff] }
 0x11b   :  { %v154_v63 = vadd.f32 %v736_v61, %v148_v62  ;;  %v376_v61 = vld [vmem:[#allocation2 + $0x188] sm:$0xff]  ;;  %v375_v62 = vld [vmem:[#allocation2 + $0x180] sm:$0xff] }
 0x11d   :  { %918 = vmatmul.mubr.f32.vlgmr.msra.gmra.mxu1 %v154_v63  ;;  %v740_v63 = vld [vmem:[%s1305_s2 + $0x6] ss:$0 sm:$0xff] }
 0x11e   :  { %987 = vmatprep.mubr.msk.f32.mxu1 %vm1122_vm0, %v1121_v0  ;;  %956 = vmatpush3.msra.mxu1 %v390_v17  ;;  %v504_v17 = vld [vmem:[#allocation2 + $0x218] sm:$0xff] }
 0x11f   :  { %957 = vmatprep.subr.mxu1 %v1121_v0 }
 0x120   :  { %958 = vmatpush3.msra.mxu1 %v389_v18  ;;  %v503_v18 = vld [vmem:[#allocation2 + $0x210] sm:$0xff] }
 0x121   :  { %959 = vmatprep.subr.mxu1 %v1121_v0 }
 0x122   :  { %960 = vmatpush3.msra.mxu1 %v388_v19  ;;  %v502_v19 = vld [vmem:[#allocation2 + $0x208] sm:$0xff] }
 0x123   :  { %961 = vmatprep.subr.mxu1 %v1121_v0 }
 0x124   :  { %962 = vmatpush3.msra.mxu1 %v387_v20  ;;  %v501_v20 = vld [vmem:[#allocation2 + $0x200] sm:$0xff] }
 0x125   :  { %963 = vmatprep.subr.mxu1 %v1121_v0 }
 0x126   :  { %964 = vmatpush3.msra.mxu1 %v386_v21  ;;  %v741_v21 = vld [vmem:[%s1305_s2 + $0x7] ss:$0 sm:$0xff] }
 0x127   :  { %965 = vmatprep.subr.mxu1 %v1121_v0 }
 0x128   :  { %966 = vmatpush3.msra.mxu1 %v385_v22 }
 0x129   :  { %967 = vmatprep.subr.mxu1 %v1121_v0 }
 0x12a   :  { %968 = vmatpush3.msra.mxu1 %v384_v23 }
 0x12b   :  { %969 = vmatprep.subr.mxu1 %v1121_v0 }
 0x12c   :  { %970 = vmatpush3.msra.mxu1 %v383_v24 }
 0x12d   :  { %971 = vmatprep.subr.mxu1 %v1121_v0 }
 0x12e   :  { %972 = vmatpush3.msra.mxu1 %v382_v25 }
 0x12f   :  { %973 = vmatprep.subr.mxu1 %v1121_v0 }
 0x130   :  { %974 = vmatpush3.msra.mxu1 %v381_v26 }
 0x131   :  { %975 = vmatprep.subr.mxu1 %v1121_v0 }
 0x132   :  { %976 = vmatpush3.msra.mxu1 %v380_v27 }
 0x133   :  { %977 = vmatprep.subr.mxu1 %v1121_v0 }
 0x134   :  { %978 = vmatpush3.msra.mxu1 %v379_v28 }
 0x135   :  { %979 = vmatprep.subr.mxu1 %v1121_v0 }
 0x136   :  { %980 = vmatpush3.msra.mxu1 %v378_v29 }
 0x137   :  { %981 = vmatprep.subr.mxu1 %v1121_v0 }
 0x138   :  { %982 = vmatpush3.msra.mxu1 %v377_v60  ;;  %v633_v60 = vld [vmem:[#allocation2 + $0x2b0] sm:$0xff] }
 0x139   :  { %983 = vmatprep.subr.mxu1 %v1121_v0 }
 0x13a   :  { %984 = vmatpush3.msra.mxu1 %v376_v61  ;;  %v632_v61 = vld [vmem:[#allocation2 + $0x2a8] sm:$0xff] }
 0x13b   :  { %985 = vmatprep.subr.mxu1 %v1121_v0 }
 0x13c   :  { %986 = vmatpush3.msra.mxu1 %v375_v62  ;;  %v631_v62 = vld [vmem:[#allocation2 + $0x2a0] sm:$0xff] }
 0x13d   :  { %1025 = vmatprep.subr.mxu1 %v1121_v0 }
 0x1dd   :  { %v243_v31 = vpop.f32.mrf.mxu1 }
 0x1de   :  { %v244_v32 = vadd.f32 %v737_v30, %v243_v31 }
 0x1df   :  { %v919_v33 = vpop.f32.mrf.mxu1 }
 0x1e0   :  { %v247_v34 = vmax.f32 %v244_v32, 0.0 }
 0x1e2   :  { %v248_v35 = vrot.slane %v247_v34, 4  ;;  %v254_v36 = vmul.f32 %v247_v34, %v247_v34 }
 0x1e4   :  { %v249_v37 = vadd.f32 %v248_v35, %v247_v34  ;;  %v255_v38 = vrot.slane %v254_v36, 4 }
 0x1e6   :  { %v250_v39 = vrot.slane %v249_v37, 2  ;;  %v256_v40 = vadd.f32 %v255_v38, %v254_v36 }
 0x1e8   :  { %v251_v41 = vadd.f32 %v250_v39, %v249_v37  ;;  %v257_v42 = vrot.slane %v256_v40, 2 }
 0x1ea   :  { %v252_v43 = vrot.slane %v251_v41, 1  ;;  %v258_v44 = vadd.f32 %v257_v42, %v256_v40 }
 0x1ec   :  { %v253_v45 = vadd.f32 %v252_v43, %v251_v41  ;;  %v259_v46 = vrot.slane %v258_v44, 1 }
 0x1ee   :  { %v260_v47 = vadd.f32 %v259_v46, %v258_v44  ;;  %v261_v48 = vmul.f32 0.125, %v253_v45  ;;  %v742_v46 = vld [vmem:[%s1305_s2 + $0x8] ss:$0 sm:$0xff] }
 0x1f0   :  { %v262_v49 = vmul.f32 0.125, %v260_v47  ;;  %v263_v50 = vmul.f32 %v261_v48, %v261_v48  ;;  %v267_v53 = vsub.f32 %v247_v34, %v261_v48  ;;  %v743_v48 = vld [vmem:[%s1305_s2 + $0x9] ss:$0 sm:$0xff] }
 0x1f2   :  { %v264_v51 = vsub.f32 %v262_v49, %v263_v50 }
 0x1f4   :  { %v265_v52 = vadd.f32 1e-05, %v264_v51  ;;  %v642_v51 = vld [vmem:[#allocation2 + $0x2f8] sm:$0xff] }
 0x1f6   :  { %1068 = vrsqrt.f32 %v265_v52  ;;  %v641_v52 = vld [vmem:[#allocation2 + $0x2f0] sm:$0xff] }
 0x203   :  { %v1069_v54 = vpop.eup %1068 }
 0x204   :  { %v268_v56 = vmul.f32 %v1069_v54, %v267_v53  ;;  %v640_v53 = vld [vmem:[#allocation2 + $0x2e8] sm:$0xff]  ;;  %v639_v54 = vld [vmem:[#allocation2 + $0x2e0] sm:$0xff] }
 0x206   :  { %v274_v58 = vmul.f32 %v738_v55, %v268_v56  ;;  %v638_v55 = vld [vmem:[#allocation2 + $0x2d8] sm:$0xff]  ;;  %v637_v56 = vld [vmem:[#allocation2 + $0x2d0] sm:$0xff] }
 0x208   :  { %v280_v59 = vadd.f32 %v739_v57, %v274_v58  ;;  %v636_v57 = vld [vmem:[#allocation2 + $0x2c8] sm:$0xff]  ;;  %v635_v58 = vld [vmem:[#allocation2 + $0x2c0] sm:$0xff] }
 0x20a   :  { %953 = vmatmul.mubr.f32.vlgmr.msra.gmra.mxu0 %v280_v59  ;;  %v634_v59 = vld [vmem:[#allocation2 + $0x2b8] sm:$0xff] }
 0x20b   :  { %1022 = vmatprep.mubr.msk.f32.mxu0 %vm1122_vm0, %v1121_v0  ;;  %991 = vmatpush3.msra.mxu0 %v516_v5 }
 0x20c   :  { %992 = vmatprep.subr.mxu0 %v1121_v0 }
 0x20d   :  { %993 = vmatpush3.msra.mxu0 %v515_v6 }
 0x20e   :  { %994 = vmatprep.subr.mxu0 %v1121_v0 }
 0x20f   :  { %995 = vmatpush3.msra.mxu0 %v514_v7 }
 0x210   :  { %996 = vmatprep.subr.mxu0 %v1121_v0 }
 0x211   :  { %997 = vmatpush3.msra.mxu0 %v513_v8 }
 0x212   :  { %998 = vmatprep.subr.mxu0 %v1121_v0 }
 0x213   :  { %999 = vmatpush3.msra.mxu0 %v512_v9 }
 0x214   :  { %1000 = vmatprep.subr.mxu0 %v1121_v0 }
 0x215   :  { %1001 = vmatpush3.msra.mxu0 %v511_v10 }
 0x216   :  { %1002 = vmatprep.subr.mxu0 %v1121_v0 }
 0x217   :  { %1003 = vmatpush3.msra.mxu0 %v510_v11 }
 0x218   :  { %1004 = vmatprep.subr.mxu0 %v1121_v0 }
 0x219   :  { %1005 = vmatpush3.msra.mxu0 %v509_v12 }
 0x21a   :  { %1006 = vmatprep.subr.mxu0 %v1121_v0 }
 0x21b   :  { %1007 = vmatpush3.msra.mxu0 %v508_v13 }
 0x21c   :  { %1008 = vmatprep.subr.mxu0 %v1121_v0 }
 0x21d   :  { %1009 = vmatpush3.msra.mxu0 %v507_v14 }
 0x21e   :  { %1010 = vmatprep.subr.mxu0 %v1121_v0 }
 0x21f   :  { %1011 = vmatpush3.msra.mxu0 %v506_v15 }
 0x220   :  { %1012 = vmatprep.subr.mxu0 %v1121_v0 }
 0x221   :  { %1013 = vmatpush3.msra.mxu0 %v505_v16 }
 0x222   :  { %1014 = vmatprep.subr.mxu0 %v1121_v0 }
 0x223   :  { %1015 = vmatpush3.msra.mxu0 %v504_v17 }
 0x224   :  { %1016 = vmatprep.subr.mxu0 %v1121_v0 }
 0x225   :  { %1017 = vmatpush3.msra.mxu0 %v503_v18 }
 0x226   :  { %1018 = vmatprep.subr.mxu0 %v1121_v0 }
 0x227   :  { %1019 = vmatpush3.msra.mxu0 %v502_v19 }
 0x228   :  { %1020 = vmatprep.subr.mxu0 %v1121_v0 }
 0x229   :  { %1021 = vmatpush3.msra.mxu0 %v501_v20 }
 0x2ca   :  { %v369_v1 = vpop.f32.mrf.mxu0 }
 0x2cb   :  { %v370_v2 = vadd.f32 %v740_v63, %v369_v1  ;;  %v630_v63 = vld [vmem:[#allocation2 + $0x298] sm:$0xff]  ;;  %v629_v1 = vld [vmem:[#allocation2 + $0x290] sm:$0xff] }
 0x2cc   :  { %v954_v3 = vpop.f32.mrf.mxu0 }
 0x2cd   :  { %v373_v4 = vmax.f32 %v370_v2, 0.0  ;;  %v628_v2 = vld [vmem:[#allocation2 + $0x288] sm:$0xff]  ;;  %v627_v3 = vld [vmem:[#allocation2 + $0x280] sm:$0xff] }
 0x2cf   :  { %988 = vmatmul.mubr.f32.vlgmr.msra.gmra.mxu1 %v373_v4  ;;  %v744_v4 = vld [vmem:[%s1305_s2 + $0xa] ss:$0 sm:$0xff] }
 0x2d0   :  { %1057 = vmatprep.mubr.msk.f32.mxu1 %vm1122_vm0, %v1121_v0  ;;  %1026 = vmatpush3.msra.mxu1 %v642_v51 }
 0x2d1   :  { %1027 = vmatprep.subr.mxu1 %v1121_v0 }
 0x2d2   :  { %1028 = vmatpush3.msra.mxu1 %v641_v52 }
 0x2d3   :  { %1029 = vmatprep.subr.mxu1 %v1121_v0 }
 0x2d4   :  { %1030 = vmatpush3.msra.mxu1 %v640_v53 }
 0x2d5   :  { %1031 = vmatprep.subr.mxu1 %v1121_v0 }
 0x2d6   :  { %1032 = vmatpush3.msra.mxu1 %v639_v54 }
 0x2d7   :  { %1033 = vmatprep.subr.mxu1 %v1121_v0 }
 0x2d8   :  { %1034 = vmatpush3.msra.mxu1 %v638_v55 }
 0x2d9   :  { %1035 = vmatprep.subr.mxu1 %v1121_v0 }
 0x2da   :  { %1036 = vmatpush3.msra.mxu1 %v637_v56 }
 0x2db   :  { %1037 = vmatprep.subr.mxu1 %v1121_v0 }
 0x2dc   :  { %1038 = vmatpush3.msra.mxu1 %v636_v57 }
 0x2dd   :  { %1039 = vmatprep.subr.mxu1 %v1121_v0 }
 0x2de   :  { %1040 = vmatpush3.msra.mxu1 %v635_v58 }
 0x2df   :  { %1041 = vmatprep.subr.mxu1 %v1121_v0 }
 0x2e0   :  { %1042 = vmatpush3.msra.mxu1 %v634_v59 }
 0x2e1   :  { %1043 = vmatprep.subr.mxu1 %v1121_v0 }
 0x2e2   :  { %1044 = vmatpush3.msra.mxu1 %v633_v60 }
 0x2e3   :  { %1045 = vmatprep.subr.mxu1 %v1121_v0 }
 0x2e4   :  { %1046 = vmatpush3.msra.mxu1 %v632_v61 }
 0x2e5   :  { %1047 = vmatprep.subr.mxu1 %v1121_v0 }
 0x2e6   :  { %1048 = vmatpush3.msra.mxu1 %v631_v62 }
 0x2e7   :  { %1049 = vmatprep.subr.mxu1 %v1121_v0 }
 0x2e8   :  { %1050 = vmatpush3.msra.mxu1 %v630_v63 }
 0x2e9   :  { %1051 = vmatprep.subr.mxu1 %v1121_v0 }
 0x2ea   :  { %1052 = vmatpush3.msra.mxu1 %v629_v1 }
 0x2eb   :  { %1053 = vmatprep.subr.mxu1 %v1121_v0 }
 0x2ec   :  { %1054 = vmatpush3.msra.mxu1 %v628_v2 }
 0x2ed   :  { %1055 = vmatprep.subr.mxu1 %v1121_v0 }
 0x2ee   :  { %1056 = vmatpush3.msra.mxu1 %v627_v3 }
 0x38f   :  { %v462_v22 = vpop.f32.mrf.mxu1 }
 0x390   :  { %v463_v23 = vadd.f32 %v741_v21, %v462_v22 }
 0x391   :  { %v989_v24 = vpop.f32.mrf.mxu1 }
 0x392   :  { %v466_v25 = vmax.f32 %v463_v23, 0.0 }
 0x394   :  { %v467_v26 = vrot.slane %v466_v25, 4  ;;  %v473_v27 = vmul.f32 %v466_v25, %v466_v25 }
 0x396   :  { %v468_v28 = vadd.f32 %v467_v26, %v466_v25  ;;  %v474_v29 = vrot.slane %v473_v27, 4 }
 0x398   :  { %v469_v30 = vrot.slane %v468_v28, 2  ;;  %v475_v31 = vadd.f32 %v474_v29, %v473_v27 }
 0x39a   :  { %v470_v32 = vadd.f32 %v469_v30, %v468_v28  ;;  %v476_v33 = vrot.slane %v475_v31, 2  ;;  %v745_v28 = vld [vmem:[%s1305_s2 + $0xb] ss:$0 sm:$0xff]  ;;  %v746_v30 = vld [vmem:[%s1305_s2 + $0xc] ss:$0 sm:$0xff] }
 0x39c   :  { %v471_v34 = vrot.slane %v470_v32, 1  ;;  %v477_v35 = vadd.f32 %v476_v33, %v475_v31  ;;  %v747_v33 = vld [vmem:[%s1305_s2 + $0xd] ss:$0 sm:$0xff] }
 0x39e   :  { %v472_v36 = vadd.f32 %v471_v34, %v470_v32  ;;  %v478_v37 = vrot.slane %v477_v35, 1 }
 0x3a0   :  { %v479_v38 = vadd.f32 %v478_v37, %v477_v35  ;;  %v480_v39 = vmul.f32 0.125, %v472_v36 }
 0x3a2   :  { %v481_v40 = vmul.f32 0.125, %v479_v38  ;;  %v482_v41 = vmul.f32 %v480_v39, %v480_v39  ;;  %v486_v44 = vsub.f32 %v466_v25, %v480_v39 }
 0x3a4   :  { %v483_v42 = vsub.f32 %v481_v40, %v482_v41 }
 0x3a6   :  { %v484_v43 = vadd.f32 1e-05, %v483_v42 }
 0x3a8   :  { %1070 = vrsqrt.f32 %v484_v43 }
 0x3b5   :  { %v1071_v45 = vpop.eup %1070 }
 0x3b6   :  { %v487_v47 = vmul.f32 %v1071_v45, %v486_v44 }
 0x3b8   :  { %v493_v49 = vmul.f32 %v742_v46, %v487_v47 }
 0x3ba   :  { %v499_v50 = vadd.f32 %v743_v48, %v493_v49 }
 0x3bc   :  { %1023 = vmatmul.mubr.f32.vlgmr.msra.gmra.mxu0 %v499_v50 }
 0x47c   :  { %v588_v5 = vpop.f32.mrf.mxu0 }
 0x47d   :  { %v589_v6 = vadd.f32 %v744_v4, %v588_v5 }
 0x47e   :  { %v1024_v7 = vpop.f32.mrf.mxu0 }
 0x47f   :  { %v592_v8 = vmax.f32 %v589_v6, 0.0 }
 0x481   :  { %v593_v9 = vrot.slane %v592_v8, 4  ;;  %v599_v10 = vmul.f32 %v592_v8, %v592_v8 }
 0x483   :  { %v594_v11 = vadd.f32 %v593_v9, %v592_v8  ;;  %v600_v12 = vrot.slane %v599_v10, 4 }
 0x485   :  { %v595_v13 = vrot.slane %v594_v11, 2  ;;  %v601_v14 = vadd.f32 %v600_v12, %v599_v10 }
 0x487   :  { %v596_v15 = vadd.f32 %v595_v13, %v594_v11  ;;  %v602_v16 = vrot.slane %v601_v14, 2 }
 0x489   :  { %v597_v17 = vrot.slane %v596_v15, 1  ;;  %v603_v18 = vadd.f32 %v602_v16, %v601_v14 }
 0x48b   :  { %v598_v0 = vadd.f32 %v597_v17, %v596_v15  ;;  %v604_v19 = vrot.slane %v603_v18, 1 }
 0x48d   :  { %v605_v20 = vadd.f32 %v604_v19, %v603_v18  ;;  %v606_v21 = vmul.f32 0.125, %v598_v0 }
 0x48f   :  { %v607_v22 = vmul.f32 0.125, %v605_v20  ;;  %v608_v23 = vmul.f32 %v606_v21, %v606_v21  ;;  %v612_v26 = vsub.f32 %v592_v8, %v606_v21 }
 0x491   :  { %v609_v24 = vsub.f32 %v607_v22, %v608_v23 }
 0x493   :  { %v610_v25 = vadd.f32 1e-05, %v609_v24 }
 0x495   :  { %1072 = vrsqrt.f32 %v610_v25 }
 0x4a2   :  { %v1073_v27 = vpop.eup %1072 }
 0x4a3   :  { %v613_v29 = vmul.f32 %v1073_v27, %v612_v26 }
 0x4a5   :  { %v619_v31 = vmul.f32 %v745_v28, %v613_v29 }
 0x4a7   :  { %v625_v32 = vadd.f32 %v746_v30, %v619_v31 }
 0x4a9   :  { %1058 = vmatmul.mubr.f32.vlgmr.msra.gmra.mxu1 %v625_v32 }
 0x569   :  { %v714_v34 = vpop.f32.mrf.mxu1 }
 0x56a   :  { %v715_v35 = vadd.f32 %v747_v33, %v714_v34 }
 0x56b   :  { %v1059_v36 = vpop.f32.mrf.mxu1 }
 0x56c   :  { %718 = vst [vmem:[#allocation5] sm:$0xff] %v715_v35 }
 0x56d   :  { %1105 = shalt.err (!%p1102_p9)
}
 0x56e   :  { %728 = dma.vmem_to_hbm [thread:$0]  %s726_s0, 128, %s1306_s3, [#allocation4]  }
 0x56f   :  { %1116 = dma.done.wait [#allocation4], 128  }
 0x570   :  { %1117 = vsyncadd [#allocation4], 4294967168 }
 0x571   :  { %732 = vsyncpa [#allocation3], 1 }
 0x572   :  { %733 = vsyncpa [#allocation4], 1 }

</bundles_post_ra>
